<compile_context>
chip_gen: v6e
topology: v6e:2x2x1
jax: 0.10.0
libtpu: 0.0.40
codegen_flags: <defaults>
</compile_context>

<pallas_src>
import functools
import math

import jax
import jax.numpy as jnp
from jax.experimental import pallas as pl
from jax.experimental.pallas import tpu as pltpu


def _round_up(x: int, m: int) -> int:
    return (x + m - 1) // m * m


# ---------------------------------------------------------------------------
# Kernel
# ---------------------------------------------------------------------------
def _make_fc_kernel(n_hidden: int, activation, compute_dtype):
    """Build a kernel for a fixed number of hidden layers.

    Ref order:
      x,
      (Wh_0, bh_0, ..., Wh_{n_hidden-1}, bh_{n_hidden-1}),   # hidden layers
      W_head_fused, b_head_fused,                            # fused heads
      out_fused
    Weights arrive already cast to `compute_dtype`; biases are f32.
    """

    def kernel(*refs):
        x_ref = refs[0]
        idx = 1

        # MXU operands in compute_dtype (bf16); accumulate in f32.
        h = x_ref[...].astype(compute_dtype)

        # Hidden layers: Linear -> activation (bias add + activation in f32).
        for _ in range(n_hidden):
            w = refs[idx][...]           # (in, out)  compute_dtype
            b = refs[idx + 1][...]       # (1, out)   f32
            idx += 2
            y = jnp.dot(h, w, preferred_element_type=jnp.float32) + b
            h = activation(y).astype(compute_dtype)

        # Fused heads: single lane-dense Linear (no activation).
        w = refs[idx][...]               # (hidden, n_pad) compute_dtype
        b = refs[idx + 1][...]           # (1, n_pad)      f32
        out_ref = refs[idx + 2]
        out_ref[...] = (
            jnp.dot(h, w, preferred_element_type=jnp.float32) + b
        ).astype(out_ref.dtype)

    return kernel


# ---------------------------------------------------------------------------
# Wrapper
# ---------------------------------------------------------------------------
def fc_network_forward(x, hidden_params, head_params, *, activation=jnp.tanh,
                       batch_tile=256, compute_dtype=jnp.bfloat16):
    """Pallas implementation of FCNetwork.forward.

    x             : (B, input_size)
    hidden_params : list of (W(in,out), b(1,out)) for the hidden layers
    head_params   : list of (W(in,out), b(1,out)) for the output heads
    returns       : list of (B, out_size_i) arrays (one per head)
    """
    B, in_size = x.shape
    n_hidden = len(hidden_params)
    head_sizes = [int(w.shape[1]) for (w, _) in head_params]
    hidden_out = int(hidden_params[-1][0].shape[1]) if n_hidden else in_size

    # ---- fuse heads into one lane-dense (hidden, n_pad) matmul ------------
    n_total = sum(head_sizes)
    n_pad = max(_round_up(n_total, 128), 128)
    w_fused = jnp.zeros((hidden_out, n_pad), jnp.float32)
    b_fused = jnp.zeros((1, n_pad), jnp.float32)
    off = 0
    for (w, b) in head_params:
        n = int(w.shape[1])
        w_fused = w_fused.at[:, off:off + n].set(w.astype(jnp.float32))
        b_fused = b_fused.at[:, off:off + n].set(
            b.reshape(1, -1).astype(jnp.float32))
        off += n

    # ---- batch tiling: clamp the tile, pad batch to a multiple of it ------
    bt = min(batch_tile, _round_up(B, 8))
    bt = max(_round_up(bt, 8), 8)
    Bp = _round_up(B, bt)
    if Bp != B:
        x = jnp.pad(x, ((0, Bp - B), (0, 0)))
    grid = (Bp // bt,)

    kernel = _make_fc_kernel(n_hidden, activation, compute_dtype)

    # ---- block specs -------------------------------------------------------
    in_specs = [pl.BlockSpec((bt, in_size), lambda i: (i, 0))]
    flat_args = [x]
    for (w, b) in hidden_params:
        wc = w.astype(compute_dtype)
        bf = b.reshape(1, -1).astype(jnp.float32)
        in_specs.append(pl.BlockSpec(wc.shape, lambda i: (0, 0)))
        in_specs.append(pl.BlockSpec(bf.shape, lambda i: (0, 0)))
        flat_args.extend([wc, bf])

    wfc = w_fused.astype(compute_dtype)
    in_specs.append(pl.BlockSpec(wfc.shape, lambda i: (0, 0)))
    in_specs.append(pl.BlockSpec(b_fused.shape, lambda i: (0, 0)))
    flat_args.extend([wfc, b_fused])

    out_shape = jax.ShapeDtypeStruct((Bp, n_pad), x.dtype)
    out_spec = pl.BlockSpec((bt, n_pad), lambda i: (i, 0))

    fused_out = pl.pallas_call(
        kernel,
        out_shape=out_shape,
        grid_spec=pltpu.PrefetchScalarGridSpec(
            num_scalar_prefetch=0,
            grid=grid,
            in_specs=in_specs,
            out_specs=out_spec,
        ),
        compiler_params=pltpu.CompilerParams(
            dimension_semantics=("parallel",),
        ),
    )(*flat_args)

    # ---- split fused output back into per-head arrays (free XLA slices) ---
    outs = []
    off = 0
    for n in head_sizes:
        outs.append(fused_out[:B, off:off + n])
        off += n
    return outs


# ---------------------------------------------------------------------------
# Deterministic parameter construction (mirrors FCNetwork.__init__)
# ---------------------------------------------------------------------------
def make_params(key, input_size, hidden_sizes, output_sizes, is_policy=False):
    """kaiming_uniform weights (fan_in based), zero biases, /100 for policy heads."""
    layer_sizes = (input_size,) + tuple(hidden_sizes)

    def kaiming_uniform(k, fan_in, fan_out):
        bound = math.sqrt(6.0 / fan_in)
        # stored as (in, out) == PyTorch (out, in) transposed
        return jax.random.uniform(k, (fan_in, fan_out), jnp.float32,
                                  minval=-bound, maxval=bound)

    hidden_params = []
    for in_s, out_s in zip(layer_sizes, layer_sizes[1:]):
        key, k = jax.random.split(key)
        w = kaiming_uniform(k, in_s, out_s)
        b = jnp.zeros((1, out_s), jnp.float32)
        hidden_params.append((w, b))

    head_params = []
    for i, out_s in enumerate(output_sizes):
        key, k = jax.random.split(key)
        w = kaiming_uniform(k, layer_sizes[-1], out_s)
        divide = is_policy[i] if isinstance(is_policy, (list, tuple)) else is_policy
        if divide:
            w = w / 100.0
        b = jnp.zeros((1, out_s), jnp.float32)
        head_params.append((w, b))

    return hidden_params, head_params


def reference_forward(x, hidden_params, head_params, activation=jnp.tanh,
                      compute_dtype=jnp.bfloat16):
    """Pure-JAX reference using the same bf16-operand / f32-accum policy."""
    h = x.astype(compute_dtype)
    for w, b in hidden_params:
        y = jnp.dot(h, w.astype(compute_dtype),
                    preferred_element_type=jnp.float32) + b.reshape(1, -1)
        h = activation(y).astype(compute_dtype)
    outs = []
    for w, b in head_params:
        outs.append(jnp.dot(h, w.astype(compute_dtype),
                            preferred_element_type=jnp.float32)
                    + b.reshape(1, -1))
    return outs


# ---------------------------------------------------------------------------
if __name__ == "__main__":
    key = jax.random.PRNGKey(0)
    key, xkey = jax.random.split(key)

    # Small FCNetwork: input 32, hidden (64, 64), two heads (4, 1), tanh.
    input_size = 32
    hidden_sizes = (64, 64)
    output_sizes = (4, 1)
    batch = 48          # not a multiple of the tile -> exercises padding path
    batch_tile = 32     # small tile for the test; use 256-1024 in production

    hidden_params, head_params = make_params(
        key, input_size, hidden_sizes, output_sizes, is_policy=[True, False]
    )
    x = jax.random.normal(xkey, (batch, input_size), jnp.float32)

    outs = fc_network_forward(x, hidden_params, head_params,
                              activation=jnp.tanh, batch_tile=batch_tile)
    outs = [jax.block_until_ready(o) for o in outs]

    refs = reference_forward(x, hidden_params, head_params, activation=jnp.tanh)
    for o, r, osz in zip(outs, refs, output_sizes):
        assert o.shape == (batch, osz), (o.shape, (batch, osz))
        assert jnp.allclose(o, r, atol=1e-4, rtol=1e-4), "mismatch vs reference"

    print("KERNEL_OK")
</pallas_src>

<mosaic_0001>
module attributes {stable_mosaic.version = 11 : i64} {
  func.func @kernel(%arg0: i32, %arg1: memref<32x32xf32, #tpu.memory_space<vmem>>, %arg2: memref<32x64xbf16, #tpu.memory_space<vmem>>, %arg3: memref<1x64xf32, #tpu.memory_space<vmem>>, %arg4: memref<64x64xbf16, #tpu.memory_space<vmem>>, %arg5: memref<1x64xf32, #tpu.memory_space<vmem>>, %arg6: memref<64x128xbf16, #tpu.memory_space<vmem>>, %arg7: memref<1x128xf32, #tpu.memory_space<vmem>>, %arg8: memref<32x128xf32, #tpu.memory_space<vmem>>) attributes {dimension_semantics = [#tpu.dimension_semantics<parallel>], iteration_bounds = array<i64: 2>, scalar_prefetch = 0 : i64, scratch_operands = 0 : i64, tpu.core_type = #tpu.core_type<tc>, window_params = [{transform_indices = @transform_0, window_bounds = array<i64: 32, 32>}, {pipeline_mode = #tpu.pipeline_mode<synchronous>, transform_indices = @transform_1, window_bounds = array<i64: 32, 64>}, {pipeline_mode = #tpu.pipeline_mode<synchronous>, transform_indices = @transform_2, window_bounds = array<i64: 1, 64>}, {pipeline_mode = #tpu.pipeline_mode<synchronous>, transform_indices = @transform_3, window_bounds = array<i64: 64, 64>}, {pipeline_mode = #tpu.pipeline_mode<synchronous>, transform_indices = @transform_4, window_bounds = array<i64: 1, 64>}, {pipeline_mode = #tpu.pipeline_mode<synchronous>, transform_indices = @transform_5, window_bounds = array<i64: 64, 128>}, {pipeline_mode = #tpu.pipeline_mode<synchronous>, transform_indices = @transform_6, window_bounds = array<i64: 1, 128>}, {transform_indices = @transform_7, window_bounds = array<i64: 32, 128>}]} {
    %c0 = arith.constant 0 : index
    %c0_0 = arith.constant 0 : index
    %0 = vector.load %arg1[%c0, %c0_0] : memref<32x32xf32, #tpu.memory_space<vmem>>, vector<32x32xf32>
    %1 = arith.truncf %0 : vector<32x32xf32> to vector<32x32xbf16>
    %c0_1 = arith.constant 0 : index
    %c0_2 = arith.constant 0 : index
    %2 = vector.load %arg2[%c0_1, %c0_2] : memref<32x64xbf16, #tpu.memory_space<vmem>>, vector<32x64xbf16>
    %c0_3 = arith.constant 0 : index
    %c0_4 = arith.constant 0 : index
    %3 = vector.load %arg3[%c0_3, %c0_4] : memref<1x64xf32, #tpu.memory_space<vmem>>, vector<1x64xf32>
    %cst = arith.constant dense<0.000000e+00> : vector<32x64xf32>
    %4 = tpu.matmul %1, %2, %cst {dimension_numbers = #tpu.dot_dimension_numbers<[1], [0], [0], [1], [0, 0, 1, 1], [], []>} : vector<32x32xbf16>, vector<32x64xbf16>, vector<32x64xf32> -> vector<32x64xf32>
    %5 = vector.broadcast %3 : vector<1x64xf32> to vector<32x64xf32>
    %6 = arith.addf %4, %5 : vector<32x64xf32>
    %7 = math.tanh %6 : vector<32x64xf32>
    %8 = arith.truncf %7 : vector<32x64xf32> to vector<32x64xbf16>
    %c0_5 = arith.constant 0 : index
    %c0_6 = arith.constant 0 : index
    %9 = vector.load %arg4[%c0_5, %c0_6] : memref<64x64xbf16, #tpu.memory_space<vmem>>, vector<64x64xbf16>
    %c0_7 = arith.constant 0 : index
    %c0_8 = arith.constant 0 : index
    %10 = vector.load %arg5[%c0_7, %c0_8] : memref<1x64xf32, #tpu.memory_space<vmem>>, vector<1x64xf32>
    %cst_9 = arith.constant dense<0.000000e+00> : vector<32x64xf32>
    %11 = tpu.matmul %8, %9, %cst_9 {dimension_numbers = #tpu.dot_dimension_numbers<[1], [0], [0], [1], [0, 0, 1, 1], [], []>} : vector<32x64xbf16>, vector<64x64xbf16>, vector<32x64xf32> -> vector<32x64xf32>
    %12 = vector.broadcast %10 : vector<1x64xf32> to vector<32x64xf32>
    %13 = arith.addf %11, %12 : vector<32x64xf32>
    %14 = math.tanh %13 : vector<32x64xf32>
    %15 = arith.truncf %14 : vector<32x64xf32> to vector<32x64xbf16>
    %c0_10 = arith.constant 0 : index
    %c0_11 = arith.constant 0 : index
    %16 = vector.load %arg6[%c0_10, %c0_11] : memref<64x128xbf16, #tpu.memory_space<vmem>>, vector<64x128xbf16>
    %c0_12 = arith.constant 0 : index
    %c0_13 = arith.constant 0 : index
    %17 = vector.load %arg7[%c0_12, %c0_13] : memref<1x128xf32, #tpu.memory_space<vmem>>, vector<1x128xf32>
    %cst_14 = arith.constant dense<0.000000e+00> : vector<32x128xf32>
    %18 = tpu.matmul %15, %16, %cst_14 {dimension_numbers = #tpu.dot_dimension_numbers<[1], [0], [0], [1], [0, 0, 1, 1], [], []>} : vector<32x64xbf16>, vector<64x128xbf16>, vector<32x128xf32> -> vector<32x128xf32>
    %19 = vector.broadcast %17 : vector<1x128xf32> to vector<32x128xf32>
    %20 = arith.addf %18, %19 : vector<32x128xf32>
    %c0_15 = arith.constant 0 : index
    %c0_16 = arith.constant 0 : index
    %21 = vector.load %arg8[%c0_15, %c0_16] : memref<32x128xf32, #tpu.memory_space<vmem>>, vector<32x128xf32>
    tpu.vector_store %arg8[%c0_15, %c0_16], %20 {strides = array<i32>} : memref<32x128xf32, #tpu.memory_space<vmem>>, vector<32x128xf32>,
    return
  }
  func.func @transform_0(%arg0: i32) -> (i32, i32) {
    %c0_i32 = arith.constant 0 : i32
    %c0_i32_0 = arith.constant 0 : i32
    return %arg0, %c0_i32 : i32, i32
  }
  func.func @transform_1(%arg0: i32) -> (i32, i32) {
    %c0_i32 = arith.constant 0 : i32
    %c0_i32_0 = arith.constant 0 : i32
    %c0_i32_1 = arith.constant 0 : i32
    return %c0_i32, %c0_i32_0 : i32, i32
  }
  func.func @transform_2(%arg0: i32) -> (i32, i32) {
    %c0_i32 = arith.constant 0 : i32
    %c0_i32_0 = arith.constant 0 : i32
    %c0_i32_1 = arith.constant 0 : i32
    return %c0_i32, %c0_i32_0 : i32, i32
  }
  func.func @transform_3(%arg0: i32) -> (i32, i32) {
    %c0_i32 = arith.constant 0 : i32
    %c0_i32_0 = arith.constant 0 : i32
    %c0_i32_1 = arith.constant 0 : i32
    return %c0_i32, %c0_i32_0 : i32, i32
  }
  func.func @transform_4(%arg0: i32) -> (i32, i32) {
    %c0_i32 = arith.constant 0 : i32
    %c0_i32_0 = arith.constant 0 : i32
    %c0_i32_1 = arith.constant 0 : i32
    return %c0_i32, %c0_i32_0 : i32, i32
  }
  func.func @transform_5(%arg0: i32) -> (i32, i32) {
    %c0_i32 = arith.constant 0 : i32
    %c0_i32_0 = arith.constant 0 : i32
    %c0_i32_1 = arith.constant 0 : i32
    return %c0_i32, %c0_i32_0 : i32, i32
  }
  func.func @transform_6(%arg0: i32) -> (i32, i32) {
    %c0_i32 = arith.constant 0 : i32
    %c0_i32_0 = arith.constant 0 : i32
    %c0_i32_1 = arith.constant 0 : i32
    return %c0_i32, %c0_i32_0 : i32, i32
  }
  func.func @transform_7(%arg0: i32) -> (i32, i32) {
    %c0_i32 = arith.constant 0 : i32
    %c0_i32_0 = arith.constant 0 : i32
    return %arg0, %c0_i32 : i32, i32
  }
}

</mosaic_0001>

<bundles_post_ra>
// kernel: tpu_custom_call.1
= control target key start
LH: loop header
LB: loop body
LE: loop exit
PB: predicated region body
PF: predicated region fallthrough
CT: control target
= control target key end

     0   :  { %12 = vsyncpa [#allocation3], 0  ;;  %s1043_s0 = inlined_call_operand.vmem [shape: f32[64,32], index: 0, kind: input, shape index: {}]   ;;  %s1044_s1 = inlined_call_operand.vmem [shape: bf16[32,64], index: 1, kind: input, shape index: {}]   ;;  %s1045_s2 = inlined_call_operand.vmem [shape: f32[1,64], index: 2, kind: input, shape index: {}]   ;;  %s1046_s3 = inlined_call_operand.vmem [shape: bf16[64,64], index: 3, kind: input, shape index: {}]   ;;  %s1047_s4 = inlined_call_operand.vmem [shape: f32[1,64], index: 4, kind: input, shape index: {}]   ;;  %s1048_s5 = inlined_call_operand.vmem [shape: bf16[64,128], index: 5, kind: input, shape index: {}]   ;;  %s1049_s6 = inlined_call_operand.vmem [shape: f32[1,128], index: 6, kind: input, shape index: {}]   ;;  %s1050_s7 = inlined_call_operand.hbm [shape: f32[64,128], index: 7, kind: output, shape index: {}]  }
   0x1   :  { %14 = vsyncpa [#allocation3 + $0x1], 0  ;;  %s899_s24 = smov 0   ;;  %s901_s25 = smov 0  }
   0x2   :  { %s903_s26 = smov 0   ;;  %s905_s27 = smov 0  }
   0x3 LB: > { %s920_s28 = sadd.s32 4294967295, %s854_s27   ;;  %s647_s29 = sadd.s32 4294967294, %s854_s27   ;;  %s854_s27 = sphi %s905_s27, %s1056_s27   ;;  %s850_s26 = sphi %s903_s26, %s1055_s26   ;;  %s846_s25 = sphi %s901_s25, %s1054_s25   ;;  %s842_s24 = sphi %s899_s24, %s1053_s24  }
   0x4   : > { %s924_s30 = sadd.s32 1, %s854_s27   ;;  %s179_s8 = sadd.s32 1, %s850_s26 }
   0x5   : > { %s176_s9 = ssub.s32 %s854_s27, %s924_s30  ;;  %p189_p0 = scmp.ne.s32.totalorder %s850_s26, %s846_s25 }
   0x6   : > { %p177_p1 = scmp.eq.s32.totalorder %s176_s9, 0  ;;  %p190_p2 = scmp.eq.s32.totalorder %s920_s28, 1 }
   0x7   : > { %p195_p3 = scmp.ne.s32.totalorder %s846_s25, %s842_s24  ;;  %p196_p4 = scmp.eq.s32.totalorder %s647_s29, 1 }
   0x8   : > { %s935_s10 = scalar_select %p177_p1, %s850_s26, %s179_s8  }
   0x9   : > { %p937_p5 = por %p190_p2, %p189_p0  ;;  %p941_p6 = por %p196_p4, %p195_p3 }
   0xa   : > { %p650_p7 = scmp.ge.s32.totalorder %s854_s27, 1  ;;  %p241_p8 = scmp.lt.s32.totalorder %s854_s27, 3 }
   0xc   : > { %p242_p9 = pnand %p650_p7, %p241_p8 }
   0xd   : > { %s652_s15 = sshll.u32 (!%p242_p9), %s920_s28, 2  ;;  %s270_s14 = sand.u32 (!%p242_p9), 1, %s846_s25  }
   0xe   : > { %245 = sbr.rel (%p242_p9) target bundleno = 679 (0x2a7), region = 48  ;;  %p274_p10 = scmp.lt.s32.totalorder (!%p242_p9), %s652_s15, 7 }
   0xf   : > { %s678_s20 = sshll.u32 (!%p242_p9), %s920_s28, 9  ;;  %s1003_s29 = scalar_lea.sflag (!%p242_p9), [#allocation3], %s270_s14 }
  0x10   : > { %s1001_s23 = scalar_lea.hbm (!%p242_p9), %s1050_s7, %s678_s20  ;;  %s856_s8 = smov (!%p242_p9), [#allocation2]  }
  0x11   : > { %s798_s9 = sshll.u32 (!%p242_p9), %s856_s8, 4  ;;  %s799_s9 = int_to_ptr.vmem [resolvable:$false] %s798_s9 }
  0x12   : > { %s800_s13 = scalar_lea.vmem (!%p242_p9), %s799_s9, 1024 }
  0x13   : > { %v768_v0 = vld [vmem:[%s1044_s1 + $0x8] sm:$0xff]   ;;  %v769_v1 = vld [vmem:[%s1044_s1] sm:$0xff]   ;;  %s1058_s15 = smov (!%p274_p10, %s652_s15), 7  ;;  %vm310_vm0 = vcmask 261120   ;;  %v770_v8 = vld [vmem:[%s1046_s3 + $0x18] sm:$0xff]   ;;  %vm411_vm1 = vcmask 523264  }
  0x14   : > { %695 = vmatprep.subr.bf16.mxu0 %v768_v0  ;;  %s653_s18 = sshll.u32 %s1058_s15, 3  ;;  %v771_v9 = vld [vmem:[%s1046_s3 + $0x10] sm:$0xff]   ;;  %703 = vmatprep.subr.bf16.mxu1 %v770_v8  ;;  %v772_v10 = vld [vmem:[%s1046_s3 + $0x8] sm:$0xff]   ;;  %v773_v11 = vld [vmem:[%s1046_s3] sm:$0xff]   ;;  %s651_s15 = sshll.u32 %s270_s14, 5 }
  0x15   : > { %696 = vmatpush3.bf16.msra.mxu0 %v768_v0  ;;  %s277_s21 = scalar_lea.vmem %s1043_s0, %s653_s18  ;;  %704 = vmatpush3.bf16.msra.mxu1 %v770_v8  ;;  %v654_v13 = vld [vmem:[%s1045_s2] ss:$0 sm:$0xff]  ;;  %v774_v27 = vld [vmem:[%s1048_s5 + $0x18] sm:$0xff]   ;;  %v775_v28 = vld [vmem:[%s1048_s5 + $0x10] sm:$0xff]   ;;  %s272_s18 = scalar_lea.vmem [#allocation2], %s651_s15 }
  0x16   : > { %697 = vmatprep.subr.bf16.mxu0 %v769_v1  ;;  %v281_v2 = vld [vmem:[%s277_s21] sm:$0xff]  ;;  %v282_v3 = vld [vmem:[%s277_s21 + $0x8] sm:$0xff]  ;;  %v283_v4 = vld [vmem:[%s277_s21 + $0x10] sm:$0xff]  ;;  %705 = vmatprep.subr.bf16.mxu1 %v771_v9  ;;  %s585_s19 = sshll.u32 %s272_s18, 4  ;;  %s996_s19 = int_to_ptr.vmem [resolvable:$true] %s585_s19 }
  0x17   : > { %v285_v5 = vpack.c.bf16 %v282_v3, %v281_v2  ;;  %v284_v6 = vld [vmem:[%s277_s21 + $0x18] sm:$0xff]  ;;  %v776_v29 = vld [vmem:[%s1048_s5 + $0x8] sm:$0xff]   ;;  %v777_v30 = vld [vmem:[%s1048_s5] sm:$0xff]   ;;  %s794_s28 = scalar_lea.vmem %s996_s19, 512  ;;  %p801_p0 = scmp.lt.s32.totalorder %s996_s19, %s799_s9 }
  0x18   : > { %v286_v7 = vpack.c.bf16 %v284_v6, %v283_v4  ;;  %v659_v32 = vld [vmem:[%s1047_s4] ss:$0 sm:$0xff]  ;;  %p795_p11 = scmp.ne.s32.totalorder %s996_s19, %s794_s28  ;;  %p802_p1 = scmp.lt.s32.totalorder %s800_s13, %s794_s28 }
  0x19   : > { %698 = vmatpush3.bf16.msra.mxu0 %v769_v1  ;;  %699 = vmatprep.mubr.msk.bf16.mxu0 %vm310_vm0, %v285_v5  ;;  %v666_v46 = vld [vmem:[%s1049_s6] ss:$0 sm:$0xff] }
  0x1a   : > { %706 = vmatpush3.bf16.msra.mxu1 %v771_v9  ;;  %715 = vmatprep.subr.bf16.mxu0 %v774_v27  ;;  %p796_p12 = pnand %p795_p11, %p937_p5  ;;  %p803_p2 = por %p802_p1, %p801_p0 }
  0x1b   : > { %707 = vmatprep.subr.bf16.mxu1 %v772_v10 }
  0x1c   : > { %700 = vmatmul.mubr.msk.bf16.vlgmr.msra.gmra.mxu0 %vm310_vm0, %v286_v7  ;;  %p797_p13 = pneg %p796_p12 }
  0x1d   : > { %716 = vmatpush3.bf16.msra.mxu0 %v774_v27 }
  0x1e   : > { %708 = vmatpush3.bf16.msra.mxu1 %v772_v10  ;;  %717 = vmatprep.subr.bf16.mxu0 %v775_v28  ;;  %p804_p3 = pnand %p803_p2, %p797_p13 }
  0x1f   : > { %709 = vmatprep.subr.bf16.mxu1 %v773_v11 }
  0x21   : > { %718 = vmatpush3.bf16.msra.mxu0 %v775_v28 }
  0x22   : > { %710 = vmatpush3.bf16.msra.mxu1 %v773_v11  ;;  %719 = vmatprep.subr.bf16.mxu0 %v776_v29 }
  0x25   : > { %720 = vmatpush3.bf16.msra.mxu0 %v776_v29 }
  0x26   : > { %721 = vmatprep.subr.bf16.mxu0 %v777_v30 }
  0x29   : > { %722 = vmatpush3.bf16.msra.mxu0 %v777_v30 }
  0xdc   : > { %v701_v12 = vpop.f32.mrf.mxu0 }
  0xdd   : > { %v360_v18 = vadd.f32 %v701_v12, %v654_v13 }
  0xde   : > { %v351_v14 = vpop.f32.mrf.mxu0 }
  0xdf   : > { %v352_v15 = vadd.f32 %v654_v13, %v351_v14 }
  0xe0   : > { %v702_v16 = vpop.f32.mrf.mxu0 }
  0xe1   : > { %v363_v17 = vadd.f32 %v702_v16, %v654_v13  ;;  %778 = vtanh.f32 %v352_v15 }
  0xe2   : > { %v354_v19 = vpop.f32.mrf.mxu0 }
  0xe3   : > { %v355_v20 = vadd.f32 %v654_v13, %v354_v19  ;;  %780 = vtanh.f32 %v363_v17 }
  0xe5   : > { %782 = vtanh.f32 %v355_v20 }
  0xe6   : > { %784 = vtanh.f32 %v360_v18 }
  0xee   : > { %v779_v21 = vpop.eup %778 }
  0xf0   : > { %v781_v22 = vpop.eup %780 }
  0xf2   : > { %v783_v23 = vpop.eup %782 }
  0xf3   : > { %v785_v24 = vpop.eup %784  ;;  %v370_v25 = vpack.c.bf16 %v783_v23, %v779_v21 }
  0xf4   : > { %v371_v26 = vpack.c.bf16 %v781_v22, %v785_v24 }
  0xf5   : > { %711 = vmatprep.mubr.msk.bf16.mxu1 %vm411_vm1, %v370_v25 }
  0xf6   : > { %712 = vmatmul.mubr.msk.bf16.vlgmr.msra.gmra.mxu1 %vm411_vm1, %v371_v26 }
 0x1b6   : > { %v713_v31 = vpop.f32.mrf.mxu1 }
 0x1b7   : > { %v461_v37 = vadd.f32 %v713_v31, %v659_v32 }
 0x1b8   : > { %v452_v33 = vpop.f32.mrf.mxu1 }
 0x1b9   : > { %v453_v34 = vadd.f32 %v659_v32, %v452_v33 }
 0x1ba   : > { %v714_v35 = vpop.f32.mrf.mxu1 }
 0x1bb   : > { %v464_v36 = vadd.f32 %v714_v35, %v659_v32  ;;  %786 = vtanh.f32 %v453_v34 }
 0x1bc   : > { %v455_v38 = vpop.f32.mrf.mxu1 }
 0x1bd   : > { %v456_v39 = vadd.f32 %v659_v32, %v455_v38  ;;  %788 = vtanh.f32 %v464_v36 }
 0x1bf   : > { %790 = vtanh.f32 %v456_v39 }
 0x1c0   : > { %792 = vtanh.f32 %v461_v37 }
 0x1c8   : > { %v787_v40 = vpop.eup %786 }
 0x1ca   : > { %v789_v41 = vpop.eup %788 }
 0x1cc   : > { %v791_v42 = vpop.eup %790 }
 0x1cd   : > { %v793_v43 = vpop.eup %792  ;;  %v471_v44 = vpack.c.bf16 %v791_v42, %v787_v40 }
 0x1ce   : > { %v472_v45 = vpack.c.bf16 %v789_v41, %v793_v43 }
 0x1cf   : > { %723 = vmatprep.mubr.msk.bf16.mxu0 %vm411_vm1, %v471_v44 }
 0x1d0   : > { %724 = vmatmul.mubr.msk.bf16.vlgmr.msra.gmra.mxu0 %vm411_vm1, %v472_v45 }
 0x290   : > { %v725_v47 = vpop.f32.mrf.mxu0 }
 0x291   : > { %v561_v48 = vadd.f32 %v725_v47, %v666_v46 }
 0x292   : > { %v552_v49 = vpop.f32.mrf.mxu0 }
 0x293   : > { %569 = vst [vmem:[%s272_s18 + $0x10] sm:$0xff] %v561_v48  ;;  %v553_v50 = vadd.f32 %v666_v46, %v552_v49 }
 0x294   : > { %v726_v51 = vpop.f32.mrf.mxu0 }
 0x295   : > { %567 = vst [vmem:[%s272_s18] sm:$0xff] %v553_v50  ;;  %v564_v52 = vadd.f32 %v726_v51, %v666_v46 }
 0x296   : > { %v555_v53 = vpop.f32.mrf.mxu0 }
 0x297   : > { %570 = vst [vmem:[%s272_s18 + $0x18] sm:$0xff] %v564_v52  ;;  %v556_v54 = vadd.f32 %v666_v46, %v555_v53 }
 0x299   : > { %568 = vst [vmem:[%s272_s18 + $0x8] sm:$0xff] %v556_v54 }
 0x29a   : > { %807 = shalt.err (!%p804_p3)
}
 0x29b   : > { %s808_s14 = scalar_lea.hbm %s1001_s23, 512  ;;  %s812_s17 = scalar_lea.hbm %s1050_s7, 1024 }
 0x29c   : > { %p809_p4 = scmp.ne.s32.totalorder %s1001_s23, %s808_s14  ;;  %p813_p9 = scmp.lt.s32.totalorder %s1001_s23, %s1050_s7 }
 0x29d   : > { %p814_p10 = scmp.lt.s32.totalorder %s812_s17, %s808_s14 }
 0x29e   : > { %p810_p7 = pnand %p809_p4, %p937_p5 }
 0x29f   : > { %p815_p11 = por %p814_p10, %p813_p9 }
 0x2a0   : > { %p811_p8 = pneg %p810_p7 }
 0x2a2   : > { %p816_p12 = pnand %p815_p11, %p811_p8 }
 0x2a4   : > { %819 = shalt.err (!%p816_p12)
}
 0x2a5   : > { %s857_s21 = smov 128   ;;  %s858_s22 = smov 8  }
 0x2a6   : > { %727 = dma.vmem_to_hbm [thread:$0]  (%p937_p5), %s996_s19, 512, %s1001_s23, %s1003_s29, %s857_s21, %s857_s21, %s858_s22  }
 0x2a7 PF: > { %p733_p13 = scmp.ge.s32.totalorder %s854_s27, 2  ;;  %s600_s28 = sand.u32 1, %s842_s24  }
 0x2a8   : > { %s601_s8 = scalar_lea.sflag [#allocation3], %s600_s28 }
 0x2a9   : > { %p730_p0 = pnand %p733_p13, %p941_p6 }
 0x2ab   : > { %p731_p1 = pneg %p730_p0 }
 0x2ad   : > { %837 = dma.done.wait (%p731_p1), %s601_s8, 512  }
 0x2ae   : > { %839 = vsyncadd (%p731_p1), %s601_s8, 4294966784  ;;  %p17_p2 = scmp.ge.s32.totalorder %s924_s30, 4   ;;  %s1053_s24 = smov %s846_s25 }
 0x2af   : > { %s1054_s25 = smov %s850_s26  ;;  %s1055_s26 = smov %s935_s10 }
 0x2b0   : > { %s1056_s27 = smov %s924_s30  ;;  %19 = sbr.rel (!%p17_p2) target bundleno = 3 (0x3), region = 83 }
 0x2b5   :  { %606 = vsyncpa [#allocation3], 1 }
 0x2b6   :  { %608 = vsyncpa [#allocation3 + $0x1], 1 }

</bundles_post_ra>
